<compile_context>
chip_gen: v6e
topology: v6e:2x2x1
jax: 0.10.0
libtpu: 0.0.40
codegen_flags: <defaults>
</compile_context>

<pallas_src>
import jax
import jax.numpy as jnp
from jax.experimental import pallas as pl
from jax.experimental.pallas import tpu as pltpu

_LANE = 128
_SUBLANE = 8
# Per-array tile budget.  3 big arrays (x0, eta, out) x 2 pipeline buffers
# x 2 MiB = 12 MiB < 16 MiB (v5e default scoped VMEM); scales are negligible.
_TILE_BYTES = 2 * 1024 * 1024


def _ddpm_forward_kernel(sab_ref, somab_ref, x0_ref, eta_ref, out_ref):
    # sab_ref / somab_ref : VMEM (bn, 1, 128) f32 per-sample scales.
    # x0_ref / eta_ref / out_ref : VMEM (bn, r_tile, 128) tiles.
    sa = sab_ref[...]                      # (bn, 1, 128) -> sublane-broadcast
    sb = somab_ref[...]
    x0 = x0_ref[...].astype(jnp.float32)
    eta = eta_ref[...].astype(jnp.float32)
    out_ref[...] = (sa * x0 + sb * eta).astype(out_ref.dtype)


def make_alpha_bars(n_steps=200, min_beta=1e-4, max_beta=0.02, dtype=jnp.float32):
    betas = jnp.linspace(min_beta, max_beta, n_steps, dtype=dtype)
    alphas = 1.0 - betas
    alpha_bars = jnp.cumprod(alphas)
    return betas, alphas, alpha_bars


def ddpm_forward(x0, t, alpha_bars, eta):
    """noisy = sqrt(abar_t)*x0 + sqrt(1-abar_t)*eta, abar_t = alpha_bars[t]."""
    n, c, h, w = x0.shape
    d = c * h * w
    itemsize = jnp.dtype(x0.dtype).itemsize

    # --- tile geometry: lane-dense, sublane-packed, ~_TILE_BYTES per array ---
    r = pl.cdiv(d, _LANE)                                     # 128-lane rows / sample
    r8 = ((r + _SUBLANE - 1) // _SUBLANE) * _SUBLANE          # sublane-aligned rows
    row_bytes = r8 * _LANE * itemsize                         # bytes of one sample slab

    if row_bytes <= _TILE_BYTES:
        # Whole sample fits in one tile -> block over the batch dimension too.
        r_tile = r8
        num_row_tiles = 1
        bn = max(1, min(n, _TILE_BYTES // row_bytes))
    else:
        # Huge images: one sample per block, tile over rows.
        bn = 1
        r_tile = max(_SUBLANE,
                     (_TILE_BYTES // (_LANE * itemsize)) // _SUBLANE * _SUBLANE)
        num_row_tiles = pl.cdiv(r, r_tile)

    r_pad = num_row_tiles * r_tile
    d_pad = r_pad * _LANE
    n_pad = pl.cdiv(n, bn) * bn

    # --- flatten + pad (pure elementwise op, so zero padding is harmless) ---
    x0_flat = x0.reshape(n, d)
    eta_flat = eta.reshape(n, d)
    if d_pad != d or n_pad != n:
        pad = ((0, n_pad - n), (0, d_pad - d))
        x0_flat = jnp.pad(x0_flat, pad)
        eta_flat = jnp.pad(eta_flat, pad)
    x0_3d = x0_flat.reshape(n_pad, r_pad, _LANE)
    eta_3d = eta_flat.reshape(n_pad, r_pad, _LANE)

    # --- hoist per-sample sqrt out of the kernel hot path ---
    a_bar_t = alpha_bars[t].astype(jnp.float32)               # (n,)
    sqrt_ab = jnp.sqrt(a_bar_t)
    sqrt_omab = jnp.sqrt(1.0 - a_bar_t)
    if n_pad != n:
        sqrt_ab = jnp.pad(sqrt_ab, (0, n_pad - n))
        sqrt_omab = jnp.pad(sqrt_omab, (0, n_pad - n))
    # Lane-replicated (N,1,128) so the kernel only needs a sublane broadcast.
    sab = jnp.broadcast_to(sqrt_ab[:, None, None], (n_pad, 1, _LANE))
    somab = jnp.broadcast_to(sqrt_omab[:, None, None], (n_pad, 1, _LANE))

    grid = (n_pad // bn, num_row_tiles)

    noisy_3d = pl.pallas_call(
        _ddpm_forward_kernel,
        out_shape=jax.ShapeDtypeStruct((n_pad, r_pad, _LANE), x0.dtype),
        grid=grid,
        in_specs=[
            pl.BlockSpec((bn, 1, _LANE), lambda i, j: (i, 0, 0)),
            pl.BlockSpec((bn, 1, _LANE), lambda i, j: (i, 0, 0)),
            pl.BlockSpec((bn, r_tile, _LANE), lambda i, j: (i, j, 0)),
            pl.BlockSpec((bn, r_tile, _LANE), lambda i, j: (i, j, 0)),
        ],
        out_specs=pl.BlockSpec((bn, r_tile, _LANE), lambda i, j: (i, j, 0)),
        compiler_params=pltpu.CompilerParams(
            dimension_semantics=("parallel", "parallel"),
        ),
    )(sab, somab, x0_3d, eta_3d)

    noisy_flat = noisy_3d[:n].reshape(n, d_pad)[:, :d]
    return noisy_flat.reshape(n, c, h, w)


# TODO(synk): MyDDPM.backward delegates to an arbitrary `network` module
# (e.g. a UNet) which is not defined in this file; only the forward
# (diffusion noising) pass is implemented here.


if __name__ == "__main__":
    key = jax.random.PRNGKey(0)
    k_x, k_eta, k_t = jax.random.split(key, 3)

    # Small shapes consistent with the module: batch=2, channels=4, spatial=16.
    N, C, H, W = 2, 4, 16, 16
    n_steps = 200

    x0 = jax.random.normal(k_x, (N, C, H, W), dtype=jnp.float32)
    eta = jax.random.normal(k_eta, (N, C, H, W), dtype=jnp.float32)
    t = jax.random.randint(k_t, (N,), 0, n_steps)

    _, _, alpha_bars = make_alpha_bars(n_steps=n_steps)

    noisy = ddpm_forward(x0, t, alpha_bars, eta)
    noisy = jax.block_until_ready(noisy)

    # Reference check in plain JAX (same math as the PyTorch forward).
    a_bar = alpha_bars[t].reshape(N, 1, 1, 1)
    ref = jnp.sqrt(a_bar) * x0 + jnp.sqrt(1.0 - a_bar) * eta
    assert noisy.shape == (N, C, H, W)
    assert jnp.allclose(noisy, ref, atol=1e-6, rtol=1e-6)

    print("KERNEL_OK")
</pallas_src>

<mosaic_0001>
module attributes {stable_mosaic.version = 11 : i64} {
  func.func @_ddpm_forward_kernel(%arg0: i32, %arg1: i32, %arg2: memref<2x1x128xf32, #tpu.memory_space<vmem>>, %arg3: memref<2x1x128xf32, #tpu.memory_space<vmem>>, %arg4: memref<2x8x128xf32, #tpu.memory_space<vmem>>, %arg5: memref<2x8x128xf32, #tpu.memory_space<vmem>>, %arg6: memref<2x8x128xf32, #tpu.memory_space<vmem>>) attributes {dimension_semantics = [#tpu.dimension_semantics<parallel>, #tpu.dimension_semantics<parallel>], iteration_bounds = array<i64: 1, 1>, scalar_prefetch = 0 : i64, scratch_operands = 0 : i64, tpu.core_type = #tpu.core_type<tc>, window_params = [{transform_indices = @transform_0, window_bounds = array<i64: 2, 1, 128>}, {transform_indices = @transform_1, window_bounds = array<i64: 2, 1, 128>}, {transform_indices = @transform_2, window_bounds = array<i64: 2, 8, 128>}, {transform_indices = @transform_3, window_bounds = array<i64: 2, 8, 128>}, {transform_indices = @transform_4, window_bounds = array<i64: 2, 8, 128>}]} {
    %c0 = arith.constant 0 : index
    %c0_0 = arith.constant 0 : index
    %c0_1 = arith.constant 0 : index
    %0 = vector.load %arg2[%c0, %c0_0, %c0_1] : memref<2x1x128xf32, #tpu.memory_space<vmem>>, vector<2x1x128xf32>
    %c0_2 = arith.constant 0 : index
    %c0_3 = arith.constant 0 : index
    %c0_4 = arith.constant 0 : index
    %1 = vector.load %arg3[%c0_2, %c0_3, %c0_4] : memref<2x1x128xf32, #tpu.memory_space<vmem>>, vector<2x1x128xf32>
    %c0_5 = arith.constant 0 : index
    %c0_6 = arith.constant 0 : index
    %c0_7 = arith.constant 0 : index
    %2 = vector.load %arg4[%c0_5, %c0_6, %c0_7] : memref<2x8x128xf32, #tpu.memory_space<vmem>>, vector<2x8x128xf32>
    %c0_8 = arith.constant 0 : index
    %c0_9 = arith.constant 0 : index
    %c0_10 = arith.constant 0 : index
    %3 = vector.load %arg5[%c0_8, %c0_9, %c0_10] : memref<2x8x128xf32, #tpu.memory_space<vmem>>, vector<2x8x128xf32>
    %4 = vector.broadcast %0 : vector<2x1x128xf32> to vector<2x8x128xf32>
    %5 = arith.mulf %4, %2 : vector<2x8x128xf32>
    %6 = vector.broadcast %1 : vector<2x1x128xf32> to vector<2x8x128xf32>
    %7 = arith.mulf %6, %3 : vector<2x8x128xf32>
    %8 = arith.addf %5, %7 : vector<2x8x128xf32>
    %c0_11 = arith.constant 0 : index
    %c0_12 = arith.constant 0 : index
    %c0_13 = arith.constant 0 : index
    %9 = vector.load %arg6[%c0_11, %c0_12, %c0_13] : memref<2x8x128xf32, #tpu.memory_space<vmem>>, vector<2x8x128xf32>
    tpu.vector_store %arg6[%c0_11, %c0_12, %c0_13], %8 {strides = array<i32>} : memref<2x8x128xf32, #tpu.memory_space<vmem>>, vector<2x8x128xf32>,
    return
  }
  func.func @transform_0(%arg0: i32, %arg1: i32) -> (i32, i32, i32) {
    %c0_i32 = arith.constant 0 : i32
    %c0_i32_0 = arith.constant 0 : i32
    %c0_i32_1 = arith.constant 0 : i32
    return %arg0, %c0_i32, %c0_i32_0 : i32, i32, i32
  }
  func.func @transform_1(%arg0: i32, %arg1: i32) -> (i32, i32, i32) {
    %c0_i32 = arith.constant 0 : i32
    %c0_i32_0 = arith.constant 0 : i32
    %c0_i32_1 = arith.constant 0 : i32
    return %arg0, %c0_i32, %c0_i32_0 : i32, i32, i32
  }
  func.func @transform_2(%arg0: i32, %arg1: i32) -> (i32, i32, i32) {
    %c0_i32 = arith.constant 0 : i32
    %c0_i32_0 = arith.constant 0 : i32
    return %arg0, %arg1, %c0_i32 : i32, i32, i32
  }
  func.func @transform_3(%arg0: i32, %arg1: i32) -> (i32, i32, i32) {
    %c0_i32 = arith.constant 0 : i32
    %c0_i32_0 = arith.constant 0 : i32
    return %arg0, %arg1, %c0_i32 : i32, i32, i32
  }
  func.func @transform_4(%arg0: i32, %arg1: i32) -> (i32, i32, i32) {
    %c0_i32 = arith.constant 0 : i32
    %c0_i32_0 = arith.constant 0 : i32
    return %arg0, %arg1, %c0_i32 : i32, i32, i32
  }
}

</mosaic_0001>

<bundles_post_ra>
// kernel: tpu_custom_call.1
= control target key start
LH: loop header
LB: loop body
LE: loop exit
PB: predicated region body
PF: predicated region fallthrough
CT: control target
= control target key end

     0   :  { %9 = vsyncpa [#allocation3], 0  ;;  %s311_s0 = inlined_call_operand.hbm [shape: f32[2,1,128], index: 0, kind: input, shape index: {}]   ;;  %s312_s1 = inlined_call_operand.hbm [shape: f32[2,1,128], index: 1, kind: input, shape index: {}]   ;;  %s313_s2 = inlined_call_operand.hbm [shape: f32[2,8,128], index: 2, kind: input, shape index: {}]   ;;  %s314_s3 = inlined_call_operand.hbm [shape: f32[2,8,128], index: 3, kind: input, shape index: {}]   ;;  %s315_s4 = inlined_call_operand.hbm [shape: f32[2,8,128], index: 4, kind: output, shape index: {}]  }
   0x1   :  { %10 = vsyncpa [#allocation6], 0 }
   0x2   :  { %11 = vsyncpa [#allocation9], 0 }
   0x3   :  { %12 = vsyncpa [#allocation4], 0  ;;  %s253_s15 = smov [#allocation5]   ;;  %s254_s17 = smov [#allocation2]  }
   0x4   :  { %s30_s16 = sshll.u32 %s253_s15, 4  ;;  %s18_s18 = sshll.u32 %s254_s17, 4  ;;  %s31_s16 = int_to_ptr.vmem [resolvable:$true] %s30_s16  ;;  %s19_s18 = int_to_ptr.vmem [resolvable:$true] %s18_s18 }
   0x5   :  { %s153_s19 = scalar_lea.vmem %s31_s16, 32  ;;  %p158_p1 = scmp.lt.s32.totalorder %s31_s16, %s31_s16 }
   0x6   :  { %p154_p0 = scmp.ne.s32.totalorder %s31_s16, %s153_s19  ;;  %p159_p2 = scmp.lt.s32.totalorder %s153_s19, %s153_s19 }
   0x8   :  { %p160_p3 = por %p159_p2, %p158_p1 }
   0xa   :  { %p161_p4 = pnand %p160_p3, %p154_p0 }
   0xc   :  { %164 = shalt.err (!%p161_p4)
}
   0xd   :  { %s255_s20 = smov 16   ;;  %s256_s21 = smov 1  }
   0xe   :  { %36 = dma.hbm_to_vmem [thread:$0]  %s312_s1, 32, %s31_s16, [#allocation6], %s255_s20, %s255_s20, %s256_s21  }
   0xf   :  { %s173_s24 = scalar_lea.vmem %s19_s18, 32  ;;  %p178_p6 = scmp.lt.s32.totalorder %s19_s18, %s19_s18 }
  0x10   :  { %p174_p5 = scmp.ne.s32.totalorder %s19_s18, %s173_s24  ;;  %p179_p7 = scmp.lt.s32.totalorder %s173_s24, %s173_s24 }
  0x12   :  { %p180_p8 = por %p179_p7, %p178_p6 }
  0x14   :  { %p181_p9 = pnand %p180_p8, %p174_p5 }
  0x16   :  { %184 = shalt.err (!%p181_p9)
}
  0x17   :  { %24 = dma.hbm_to_vmem [thread:$0]  %s311_s0, 32, %s19_s18, [#allocation3], %s255_s20, %s255_s20, %s256_s21  }
  0x18   :  { %s257_s27 = smov [#allocation7]  }
  0x19   :  { %s42_s28 = sshll.u32 %s257_s27, 4  ;;  %s43_s28 = int_to_ptr.vmem [resolvable:$true] %s42_s28 }
  0x1a   :  { %s193_s29 = scalar_lea.vmem %s43_s28, 256  ;;  %p198_p11 = scmp.lt.s32.totalorder %s43_s28, %s43_s28 }
  0x1b   :  { %p194_p10 = scmp.ne.s32.totalorder %s43_s28, %s193_s29  ;;  %p199_p12 = scmp.lt.s32.totalorder %s193_s29, %s193_s29 }
  0x1d   :  { %p200_p13 = por %p199_p12, %p198_p11 }
  0x1f   :  { %p201_p0 = pnand %p200_p13, %p194_p10 }
  0x21   :  { %204 = shalt.err (!%p201_p0)
}
  0x22   :  { %s258_s1 = smov 128   ;;  %s259_s30 = smov 8  }
  0x23   :  { %48 = dma.hbm_to_vmem [thread:$0]  %s313_s2, 256, %s43_s28, [#allocation6], %s258_s1, %s258_s1, %s259_s30  }
  0x24   :  { %s260_s0 = smov [#allocation8]  }
  0x25   :  { %s54_s7 = sshll.u32 %s260_s0, 4  ;;  %s55_s7 = int_to_ptr.vmem [resolvable:$true] %s54_s7 }
  0x26   :  { %s213_s8 = scalar_lea.vmem %s55_s7, 256  ;;  %p218_p2 = scmp.lt.s32.totalorder %s55_s7, %s55_s7 }
  0x27   :  { %p214_p1 = scmp.ne.s32.totalorder %s55_s7, %s213_s8  ;;  %p219_p3 = scmp.lt.s32.totalorder %s213_s8, %s213_s8 }
  0x29   :  { %p220_p4 = por %p219_p3, %p218_p2 }
  0x2b   :  { %p221_p5 = pnand %p220_p4, %p214_p1 }
  0x2d   :  { %224 = shalt.err (!%p221_p5)
}
  0x2e   :  { %60 = dma.hbm_to_vmem [thread:$0]  %s314_s3, 256, %s55_s7, [#allocation9], %s258_s1, %s258_s1, %s259_s30  }
  0x2f   :  { %245 = dma.done.wait [#allocation3], 32  }
  0x30   :  { %246 = vsyncadd [#allocation3], 4294967264 }
  0x31   :  { %247 = dma.done.wait [#allocation6], 288  }
  0x32   :  { %248 = vsyncadd [#allocation6], 4294967008 }
  0x33   :  { %249 = dma.done.wait [#allocation9], 256  }
  0x34   :  { %250 = vsyncadd [#allocation9], 4294967040  ;;  %v132_v0 = vld [vmem:[#allocation2] ss:$0 sm:$0xff]  ;;  %v134_v1 = vld [vmem:[#allocation5] ss:$0 sm:$0xff] }
  0x35   :  { %v77_v2 = vld [vmem:[#allocation7] sm:$0xff]  ;;  %v79_v3 = vld [vmem:[#allocation8] sm:$0xff]  ;;  %v133_v5 = vld [vmem:[#allocation2 + $0x1] ss:$0 sm:$0xff]  ;;  %s261_s2 = smov [#allocation10]  }
  0x36   :  { %v93_v4 = vmul.f32 %v132_v0, %v77_v2  ;;  %v135_v6 = vld [vmem:[#allocation5 + $0x1] ss:$0 sm:$0xff]  ;;  %v107_v7 = vmul.f32 %v134_v1, %v79_v3  ;;  %v78_v8 = vld [vmem:[#allocation7 + $0x8] sm:$0xff]  ;;  %s118_s11 = sshll.u32 %s261_s2, 4  ;;  %s119_s11 = int_to_ptr.vmem [resolvable:$true] %s118_s11 }
  0x37   :  { %v80_v9 = vld [vmem:[#allocation8 + $0x8] sm:$0xff]  ;;  %v94_v10 = vmul.f32 %v133_v5, %v78_v8  ;;  %s225_s3 = scalar_lea.vmem %s119_s11, 256  ;;  %p230_p7 = scmp.lt.s32.totalorder %s119_s11, %s119_s11 }
  0x38   :  { %v108_v11 = vmul.f32 %v135_v6, %v80_v9  ;;  %v109_v12 = vadd.f32 %v107_v7, %v93_v4  ;;  %p226_p6 = scmp.ne.s32.totalorder %s119_s11, %s225_s3  ;;  %p231_p8 = scmp.lt.s32.totalorder %s225_s3, %s225_s3 }
  0x3a   :  { %v110_v13 = vadd.f32 %v108_v11, %v94_v10  ;;  %111 = vst [vmem:[#allocation10] sm:$0xff] %v109_v12  ;;  %p232_p9 = por %p231_p8, %p230_p7 }
  0x3c   :  { %112 = vst [vmem:[#allocation10 + $0x8] sm:$0xff] %v110_v13  ;;  %p233_p10 = pnand %p232_p9, %p226_p6 }
  0x3e   :  { %236 = shalt.err (!%p233_p10)
}
  0x3f   :  { %124 = dma.vmem_to_hbm [thread:$0]  %s119_s11, 256, %s315_s4, [#allocation4], %s258_s1, %s258_s1, %s259_s30  }
  0x40   :  { %251 = dma.done.wait [#allocation4], 256  }
  0x41   :  { %252 = vsyncadd [#allocation4], 4294967040 }
  0x42   :  { %128 = vsyncpa [#allocation3], 1 }
  0x43   :  { %129 = vsyncpa [#allocation6], 1 }
  0x44   :  { %130 = vsyncpa [#allocation9], 1 }
  0x45   :  { %131 = vsyncpa [#allocation4], 1 }

</bundles_post_ra>
